<compile_context>
chip_gen: v7x
topology: tpu7x:2x2x1
jax: 0.10.0
libtpu: 0.0.40
codegen_flags: <defaults>
</compile_context>

<pallas_src>
import functools

import jax
import jax.numpy as jnp
from jax.experimental import pallas as pl
from jax.experimental.pallas import tpu as pltpu


def mlp_kernel(xt_ref, w1_ref, w2_ref, b2_ref, w3_ref, b3_ref, o_ref):
    xt = xt_ref[...]                                                   # [F+1, TB]
    # fc1 + relu. Bias is folded into the matmul via the ones row in xt and
    # the bias column in w1 (no bias add / broadcast on the VALU).
    h1 = jnp.maximum(
        jnp.dot(w1_ref[...], xt, preferred_element_type=jnp.float32), 0.0)  # [32, TB]
    # fc2 + relu. w2 stays f32, h1 is already f32 -> no casts in the kernel.
    h2 = jnp.maximum(
        jnp.dot(w2_ref[...], h1, preferred_element_type=jnp.float32)
        + b2_ref[...], 0.0)                                            # [16, TB]
    # fc3 off the MXU: VPU multiply + sublane (XLU) reduce, then bias.
    z = jnp.sum(w3_ref[...] * h2, axis=0, keepdims=True) + b3_ref[...]  # [1, TB]
    # dropout (eval mode -> identity); sigmoid: exp (EUP) + exact reciprocal.
    o_ref[...] = pl.reciprocal(1.0 + jnp.exp(-z), approx=False)


def _round_up(n, m):
    return ((n + m - 1) // m) * m


@functools.partial(jax.jit, static_argnames=("max_block_b", "compute_dtype"))
def diabetes_mlp_forward(x, w1, b1, w2, b2, w3, b3, *, max_block_b=16384,
                         compute_dtype=jnp.float32):
    """Forward pass. PyTorch nn.Linear layouts:
    x [B, F]; w1 [32, F]; b1 [32]; w2 [16, 32]; b2 [16]; w3 [1, 16]; b3 [1].
    Returns sigmoid(fc3(relu(fc2(relu(fc1(x)))))) as [B, 1] float32."""
    B, F = x.shape
    H1, H2 = w1.shape[0], w2.shape[0]

    # Lane-axis batch tile: target ~8 grid steps, multiple of 128, clamped to
    # [4096, max_block_b], never larger than the (128-rounded) batch itself.
    # max_block_b=16384 keeps the f32 working set inside v5e's 16 MiB default
    # scoped VMEM; v6e (32 MiB) / v7x (64 MiB physical) have headroom -- do
    # not shrink tiles there, it only reintroduces per-step overhead.
    b128 = _round_up(B, 128)
    tb = _round_up(pl.cdiv(b128, 8), 128)
    tb = max(min(tb, max_block_b), 4096)
    tb = min(tb, b128)
    b_pad = _round_up(B, tb)
    grid = (b_pad // tb,)

    # Batch on the lane axis. One pad op builds the augmented input:
    #   rows 0..F-1 : x^T (tail columns padded with 1.0 -- harmless, their
    #                 outputs are discarded)
    #   row F       : all ones -> fc1 bias fold.
    xt_aug = jnp.pad(x.T.astype(compute_dtype),
                     ((0, 1), (0, b_pad - B)), constant_values=1.0)    # [F+1, B_pad]

    # fc1 weight with the bias folded in as an extra column.
    w1_aug = jnp.concatenate(
        [w1, b1.reshape(H1, 1)], axis=1).astype(compute_dtype)         # [32, F+1]
    # fc2 / fc3 params stay float32 (MXU slack; avoids VALU casts in-kernel).
    w2c = w2.astype(jnp.float32)                                       # [16, 32]
    b2c = b2.astype(jnp.float32).reshape(H2, 1)                        # [16, 1]
    w3c = w3.astype(jnp.float32).T                                     # [16, 1]
    b3c = b3.astype(jnp.float32).reshape(1, 1)                         # [1, 1]

    # Weights/biases: whole-array blocks with constant index_map -> resident
    # in VMEM; only the x tile and output tile stream through the pipeline.
    whole = lambda shape: pl.BlockSpec(shape, lambda i: (0, 0))

    flops = 2 * b_pad * ((F + 1) * H1 + H1 * H2 + H2)
    bytes_accessed = (
        xt_aug.size * xt_aug.dtype.itemsize + b_pad * 4                # x^T in, out
        + w1_aug.size * w1_aug.dtype.itemsize
        + w2c.size * 4 + w3c.size * 4 + (H2 + 1) * 4)

    out = pl.pallas_call(
        mlp_kernel,
        out_shape=jax.ShapeDtypeStruct((1, b_pad), jnp.float32),
        grid=grid,
        in_specs=[
            pl.BlockSpec((F + 1, tb), lambda i: (0, i)),   # streamed x^T tile
            whole(w1_aug.shape),
            whole(w2c.shape), whole(b2c.shape),
            whole(w3c.shape), whole(b3c.shape),
        ],
        out_specs=pl.BlockSpec((1, tb), lambda i: (0, i)),     # lane-dense store
        compiler_params=pltpu.CompilerParams(
            dimension_semantics=("parallel",)),                # v7x: both TCs
        cost_estimate=pl.CostEstimate(
            flops=flops,
            transcendentals=2 * b_pad,                         # exp + recip
            bytes_accessed=bytes_accessed),
    )(xt_aug, w1_aug, w2c, b2c, w3c, b3c)

    return out[0, :B].reshape(B, 1)


if __name__ == "__main__":
    key = jax.random.PRNGKey(0)
    kx, kp = jax.random.split(key)

    batch, features = 8, 8
    x = jax.random.normal(kx, (batch, features), jnp.float32)

    # PyTorch-style nn.Linear params: W [out, in], b [out].
    ks = jax.random.split(kp, 6)

    def lin(kw, kb, fan_in, fan_out):
        bound = 1.0 / (fan_in ** 0.5)
        w = jax.random.uniform(kw, (fan_out, fan_in), jnp.float32, -bound, bound)
        b = jax.random.uniform(kb, (fan_out,), jnp.float32, -bound, bound)
        return w, b

    w1, b1 = lin(ks[0], ks[1], features, 32)
    w2, b2 = lin(ks[2], ks[3], 32, 16)
    w3, b3 = lin(ks[4], ks[5], 16, 1)

    out = diabetes_mlp_forward(x, w1, b1, w2, b2, w3, b3)
    out = jax.block_until_ready(out)

    # Pure-JAX reference (eval-mode dropout = identity).
    h = jnp.maximum(x @ w1.T + b1, 0.0)
    h = jnp.maximum(h @ w2.T + b2, 0.0)
    ref = jax.nn.sigmoid(h @ w3.T + b3)

    assert out.shape == (batch, 1)
    assert jnp.allclose(out, ref, atol=1e-5), "f32 mismatch vs reference"

    # bf16 x/w1 path (DMA-bandwidth optimization; accumulation stays f32).
    # Accuracy/bandwidth trade-off: x and w1 are quantized to bf16 before fc1.
    out_bf16 = jax.block_until_ready(
        diabetes_mlp_forward(x, w1, b1, w2, b2, w3, b3,
                             compute_dtype=jnp.bfloat16))
    assert out_bf16.shape == (batch, 1)
    assert jnp.allclose(out_bf16, ref, atol=5e-2), "bf16 mismatch vs reference"

    print("KERNEL_OK")
</pallas_src>

<mosaic_0001>
module attributes {stable_mosaic.version = 11 : i64} {
  func.func @mlp_kernel(%arg0: i32, %arg1: memref<9x128xf32, #tpu.memory_space<vmem>>, %arg2: memref<32x9xf32, #tpu.memory_space<vmem>>, %arg3: memref<16x32xf32, #tpu.memory_space<vmem>>, %arg4: memref<16x1xf32, #tpu.memory_space<vmem>>, %arg5: memref<16x1xf32, #tpu.memory_space<vmem>>, %arg6: memref<1x1xf32, #tpu.memory_space<vmem>>, %arg7: memref<1x128xf32, #tpu.memory_space<vmem>>) attributes {dimension_semantics = [#tpu.dimension_semantics<parallel>], iteration_bounds = array<i64: 1>, scalar_prefetch = 0 : i64, scratch_operands = 0 : i64, tpu.core_type = #tpu.core_type<tc>, window_params = [{transform_indices = @transform_0, window_bounds = array<i64: 9, 128>}, {pipeline_mode = #tpu.pipeline_mode<synchronous>, transform_indices = @transform_1, window_bounds = array<i64: 32, 9>}, {pipeline_mode = #tpu.pipeline_mode<synchronous>, transform_indices = @transform_2, window_bounds = array<i64: 16, 32>}, {pipeline_mode = #tpu.pipeline_mode<synchronous>, transform_indices = @transform_3, window_bounds = array<i64: 16, 1>}, {pipeline_mode = #tpu.pipeline_mode<synchronous>, transform_indices = @transform_4, window_bounds = array<i64: 16, 1>}, {pipeline_mode = #tpu.pipeline_mode<synchronous>, transform_indices = @transform_5, window_bounds = array<i64: 1, 1>}, {transform_indices = @transform_6, window_bounds = array<i64: 1, 128>}]} {
    %c0 = arith.constant 0 : index
    %c0_0 = arith.constant 0 : index
    %0 = vector.load %arg1[%c0, %c0_0] : memref<9x128xf32, #tpu.memory_space<vmem>>, vector<9x128xf32>
    %c0_1 = arith.constant 0 : index
    %c0_2 = arith.constant 0 : index
    %1 = vector.load %arg2[%c0_1, %c0_2] : memref<32x9xf32, #tpu.memory_space<vmem>>, vector<32x9xf32>
    %cst = arith.constant dense<0.000000e+00> : vector<32x128xf32>
    %2 = tpu.matmul %1, %0, %cst {dimension_numbers = #tpu.dot_dimension_numbers<[1], [0], [0], [1], [0, 0, 1, 1], [], []>} : vector<32x9xf32>, vector<9x128xf32>, vector<32x128xf32> -> vector<32x128xf32>
    %cst_3 = arith.constant 0.000000e+00 : f32
    %3 = vector.broadcast %cst_3 : f32 to vector<32x128xf32>
    %4 = arith.maximumf %2, %3 : vector<32x128xf32>
    %c0_4 = arith.constant 0 : index
    %c0_5 = arith.constant 0 : index
    %5 = vector.load %arg3[%c0_4, %c0_5] : memref<16x32xf32, #tpu.memory_space<vmem>>, vector<16x32xf32>
    %cst_6 = arith.constant dense<0.000000e+00> : vector<16x128xf32>
    %6 = tpu.matmul %5, %4, %cst_6 {dimension_numbers = #tpu.dot_dimension_numbers<[1], [0], [0], [1], [0, 0, 1, 1], [], []>} : vector<16x32xf32>, vector<32x128xf32>, vector<16x128xf32> -> vector<16x128xf32>
    %c0_7 = arith.constant 0 : index
    %c0_8 = arith.constant 0 : index
    %7 = vector.load %arg4[%c0_7, %c0_8] : memref<16x1xf32, #tpu.memory_space<vmem>>, vector<16x1xf32>
    %8 = vector.broadcast %7 : vector<16x1xf32> to vector<16x128xf32>
    %9 = arith.addf %6, %8 : vector<16x128xf32>
    %cst_9 = arith.constant 0.000000e+00 : f32
    %10 = vector.broadcast %cst_9 : f32 to vector<16x128xf32>
    %11 = arith.maximumf %9, %10 : vector<16x128xf32>
    %c0_10 = arith.constant 0 : index
    %c0_11 = arith.constant 0 : index
    %12 = vector.load %arg5[%c0_10, %c0_11] : memref<16x1xf32, #tpu.memory_space<vmem>>, vector<16x1xf32>
    %13 = vector.broadcast %12 : vector<16x1xf32> to vector<16x128xf32>
    %14 = arith.mulf %13, %11 : vector<16x128xf32>
    %cst_12 = arith.constant dense<0.000000e+00> : vector<128xf32>
    %15 = vector.multi_reduction <add>, %14, %cst_12 [0] : vector<16x128xf32> to vector<128xf32>
    %16 = vector.shape_cast %15 : vector<128xf32> to vector<1x128xf32>
    %c0_13 = arith.constant 0 : index
    %c0_14 = arith.constant 0 : index
    %17 = vector.load %arg6[%c0_13, %c0_14] : memref<1x1xf32, #tpu.memory_space<vmem>>, vector<1x1xf32>
    %18 = vector.broadcast %17 : vector<1x1xf32> to vector<1x128xf32>
    %19 = arith.addf %16, %18 : vector<1x128xf32>
    %cst_15 = arith.constant 0.000000e+00 : f32
    %20 = vector.broadcast %cst_15 : f32 to vector<1x128xf32>
    %21 = arith.subf %20, %19 : vector<1x128xf32>
    %22 = math.exp %21 : vector<1x128xf32>
    %cst_16 = arith.constant 1.000000e+00 : f32
    %23 = vector.broadcast %cst_16 : f32 to vector<1x128xf32>
    %24 = arith.addf %23, %22 : vector<1x128xf32>
    %25 = tpu.reciprocal %24 : vector<1x128xf32> -> vector<1x128xf32>
    %c0_17 = arith.constant 0 : index
    %c0_18 = arith.constant 0 : index
    %26 = vector.load %arg7[%c0_17, %c0_18] : memref<1x128xf32, #tpu.memory_space<vmem>>, vector<1x128xf32>
    tpu.vector_store %arg7[%c0_17, %c0_18], %25 {strides = array<i32>} : memref<1x128xf32, #tpu.memory_space<vmem>>, vector<1x128xf32>,
    return
  }
  func.func @transform_0(%arg0: i32) -> (i32, i32) {
    %c0_i32 = arith.constant 0 : i32
    %c0_i32_0 = arith.constant 0 : i32
    return %c0_i32, %arg0 : i32, i32
  }
  func.func @transform_1(%arg0: i32) -> (i32, i32) {
    %c0_i32 = arith.constant 0 : i32
    %c0_i32_0 = arith.constant 0 : i32
    %c0_i32_1 = arith.constant 0 : i32
    return %c0_i32, %c0_i32_0 : i32, i32
  }
  func.func @transform_2(%arg0: i32) -> (i32, i32) {
    %c0_i32 = arith.constant 0 : i32
    %c0_i32_0 = arith.constant 0 : i32
    %c0_i32_1 = arith.constant 0 : i32
    return %c0_i32, %c0_i32_0 : i32, i32
  }
  func.func @transform_3(%arg0: i32) -> (i32, i32) {
    %c0_i32 = arith.constant 0 : i32
    %c0_i32_0 = arith.constant 0 : i32
    %c0_i32_1 = arith.constant 0 : i32
    return %c0_i32, %c0_i32_0 : i32, i32
  }
  func.func @transform_4(%arg0: i32) -> (i32, i32) {
    %c0_i32 = arith.constant 0 : i32
    %c0_i32_0 = arith.constant 0 : i32
    %c0_i32_1 = arith.constant 0 : i32
    return %c0_i32, %c0_i32_0 : i32, i32
  }
  func.func @transform_5(%arg0: i32) -> (i32, i32) {
    %c0_i32 = arith.constant 0 : i32
    %c0_i32_0 = arith.constant 0 : i32
    %c0_i32_1 = arith.constant 0 : i32
    return %c0_i32, %c0_i32_0 : i32, i32
  }
  func.func @transform_6(%arg0: i32) -> (i32, i32) {
    %c0_i32 = arith.constant 0 : i32
    %c0_i32_0 = arith.constant 0 : i32
    return %c0_i32, %arg0 : i32, i32
  }
}

</mosaic_0001>

<bundles_post_ra>
// kernel: diabetes_mlp_forward.1
= control target key start
LH: loop header
LB: loop body
LE: loop exit
PB: predicated region body
PF: predicated region fallthrough
CT: control target
= control target key end

     0   :  { %vm44_vm0 = vcmask 1040384   ;;  %vm31_vm1 = vcmask 72704   ;;  %vm339_vm2 = vmmov 1   ;;  %vm151_vm4 = vcmask 261120   ;;  %s420_s0 = inlined_call_operand.vmem [shape: f32[9,128], index: 0, kind: input, shape index: {}]   ;;  %s421_s1 = inlined_call_operand.vmem [shape: f32[32,9], index: 1, kind: input, shape index: {}]   ;;  %s422_s2 = inlined_call_operand.vmem [shape: f32[16,32], index: 2, kind: input, shape index: {}]   ;;  %s423_s3 = inlined_call_operand.vmem [shape: f32[16,1], index: 3, kind: input, shape index: {}]   ;;  %s424_s4 = inlined_call_operand.vmem [shape: f32[16,1], index: 4, kind: input, shape index: {}]   ;;  %s425_s5 = inlined_call_operand.<no memory space> [shape: f32[1,1], index: 5, kind: input, shape index: {}]   ;;  %s426_s6 = inlined_call_operand.vmem [shape: f32[1,128], index: 6, kind: output, shape index: {}]  }
   0x1   :  { %v25_v0 = vld [vmem:[%s420_s0] sm:$0xff]  ;;  %v26_v1 = vld [vmem:[%s420_s0 + $0x8] sm:$0x1]  ;;  %vm318_vm3 = vmpackc.low %vm44_vm0, %vm339_vm2  ;;  %v340_v8 = vmov 0   ;;  %v11_v11 = vstv %s425_s5  ;;  %v262_v38 = vlaneseq }
   0x2   :  { %v317_v2 = vpack.c.bf16 %v26_v1, %v25_v0  ;;  %v27_v3 = vld [vmem:[%s421_s1] sm:$0xff]  ;;  %v28_v4 = vld [vmem:[%s421_s1 + $0x8] sm:$0xff]  ;;  %v29_v5 = vld [vmem:[%s421_s1 + $0x10] sm:$0xff]  ;;  %333 = vset.pattern.permute.xlu0 %v340_v8  ;;  %334 = vset.pattern.permute.xlu1 %v340_v8  ;;  %12 = vst [vmem:[#allocation2] sm:$0x1] %v11_v11 }
   0x3   :  { %300 = vmatprep.mubr.msk.f32.mxu0 %vm31_vm1, %v27_v3  ;;  %v30_v6 = vld [vmem:[%s421_s1 + $0x18] sm:$0xff]  ;;  %v137_v7 = vld [vmem:[%s422_s2] sm:$0xff]  ;;  %v140_v12 = vld [vmem:[%s423_s3 + $0x8] sm:$0xff]  ;;  %v263_v41 = vshrl.u32 %v262_v38, 7 }
   0x4   :  { %319 = vmatprep.subr.msk.bf16.mxu0 %vm318_vm3, %v317_v2  ;;  %314 = vmatprep.mubr.msk.f32.mxu1 %vm151_vm4, %v137_v7  ;;  %v139_v9 = vld [vmem:[%s423_s3] sm:$0xff]  ;;  %v236_v13 = vld [vmem:[%s424_s4 + $0x8] sm:$0xff] }
   0x5   :  { %322 = vmatpush3.bf16.msk.msra.mxu0 %vm318_vm3, %v317_v2  ;;  %v235_v10 = vld [vmem:[%s424_s4] sm:$0xff]  ;;  %143 = vperm.xlu0 %333, %v139_v9   ;;  %v138_v25 = vld [vmem:[%s422_s2 + $0x8] sm:$0xff]  ;;  %v264_v44 = vsub.s32 0, %v263_v41 }
   0x6   :  { %239 = vperm.xlu1 %334, %v235_v10  }
   0x8   :  { %301 = vmatmul.mubr.msk.f32.vlgmr.msra.gmra.mrb[0].mxu0 %vm31_vm1, %v28_v4 }
   0x9   :  { %303 = vmatprep.mubr.msk.f32.mxu0 %vm31_vm1, %v29_v5  ;;  %148 = vperm.xlu0 %333, %v140_v12   ;;  %v256_v14 = vld [vmem:[#allocation2] sm:$0x1] }
   0xa   :  { %244 = vperm.xlu1 %334, %v236_v13  }
   0xc   :  { %304 = vmatmul.mubr.msk.f32.gmra.mrb[2].mxu0 %vm31_vm1, %v30_v6 }
   0xd   :  { %259 = vperm.xlu0 %333, %v256_v14  }
  0x84   :  { %v144_v26 = vpop.permute.xlu0 %143 }
  0x85   :  { %v240_v27 = vpop.permute.xlu1 %239 }
  0x88   :  { %v149_v28 = vpop.permute.xlu0 %148 }
  0x89   :  { %v245_v34 = vpop.permute.xlu1 %244 }
  0x8c   :  { %v260_v46 = vpop.permute.xlu0 %259 }
  0x8d   :  { %v265_v48 = vrot.slane %v260_v46, %v264_v44 }
  0xdb   :  { %v302_v15 = vpop.f32.mrb[0].mxu0 }
  0xdc   :  { %v134_v16 = vmax.f32 %v302_v15, 0.0  ;;  %v114_v17 = vpop.f32.mrb[1].mxu0 }
  0xdd   :  { %v133_v18 = vmax.f32 %v114_v17, 0.0 }
  0xdf   :  { %v305_v19 = vpop.f32.mrb[2].mxu0  ;;  %v323_v20 = vpack.c.bf16 %v134_v16, %v133_v18 }
  0xe0   :  { %v136_v21 = vmax.f32 %v305_v19, 0.0  ;;  %v124_v22 = vpop.f32.mrb[3].mxu0 }
  0xe1   :  { %v135_v23 = vmax.f32 %v124_v22, 0.0  ;;  %324 = vmatprep.subr.bf16.mxu1 %v323_v20 }
  0xe2   :  { %326 = vmatpush3.bf16.msra.mxu1 %v323_v20 }
  0xe3   :  { %v327_v24 = vpack.c.bf16 %v136_v21, %v135_v23 }
  0xe5   :  { %328 = vmatprep.subr.bf16.mxu1 %v327_v24 }
  0xe6   :  { %330 = vmatpush3.bf16.msra.mxu1 %v327_v24 }
  0xe9   :  { %315 = vmatmul.mubr.msk.f32.vlgmr.msra.gmra.mrb[0].mxu1 %vm151_vm4, %v138_v25 }
 0x1bc   :  { %v316_v29 = vpop.f32.mrb[0].mxu1 }
 0x1bd   :  { %v230_v30 = vadd.f32 %v316_v29, %v149_v28  ;;  %v224_v31 = vpop.f32.mrb[1].mxu1 }
 0x1be   :  { %v225_v32 = vadd.f32 %v224_v31, %v144_v26 }
 0x1bf   :  { %v234_v33 = vmax.f32 %v230_v30, 0.0 }
 0x1c0   :  { %v233_v35 = vmax.f32 %v225_v32, 0.0 }
 0x1c1   :  { %v248_v36 = vmul.f32 %v245_v34, %v234_v33 }
 0x1c2   :  { %v247_v37 = vmul.f32 %v240_v27, %v233_v35 }
 0x1c4   :  { %v249_v39 = vadd.f32 %v248_v36, %v247_v37 }
 0x1c6   :  { %v250_v40 = vrot.slane %v249_v39, 4 }
 0x1c8   :  { %v251_v42 = vadd.f32 %v250_v40, %v249_v39 }
 0x1ca   :  { %v252_v43 = vrot.slane %v251_v42, 2 }
 0x1cc   :  { %v253_v45 = vadd.f32 %v252_v43, %v251_v42 }
 0x1ce   :  { %v254_v47 = vrot.slane %v253_v45, 1 }
 0x1d0   :  { %v255_v49 = vadd.f32 %v254_v47, %v253_v45 }
 0x1d2   :  { %v266_v50 = vadd.f32 %v265_v48, %v255_v49 }
 0x1d4   :  { %v267_v51 = vsub.f32 0.0, %v266_v50 }
 0x1d6   :  { %v268_v52 = vmul.f32 1.442695, %v267_v51 }
 0x1d8   :  { %335 = vpow2.f32 %v268_v52 }
 0x1e2   :  { %v336_v53 = vpop.eup %335 }
 0x1e3   :  { %v270_v54 = vadd.f32 1.0, %v336_v53 }
 0x1e5   :  { %337 = vrcp.f32 %v270_v54 }
 0x1ef   :  { %v338_v55 = vpop.eup %337 }
 0x1f0   :  { %272 = vst [vmem:[%s426_s6] sm:$0x1] %v338_v55 }

</bundles_post_ra>
